<compile_context>
chip_gen: v6e
topology: v6e:2x2x1
jax: 0.10.0
libtpu: 0.0.40
codegen_flags: <defaults>
</compile_context>

<pallas_src>
import functools

import jax
import jax.numpy as jnp
from jax.experimental import pallas as pl
from jax.experimental.pallas import tpu as pltpu


def _round_up(x, m):
    return ((x + m - 1) // m) * m


def _pad_to_lanes(n):
    # v6e/v7x MXUs are 2x256x256: if the natural dim is already >=256, pad to
    # 256 so each MXU pass fills the systolic array; otherwise 128 (optimal on
    # v5e's 4x128x128 MXU and minimal waste for tiny dims like H=32).
    return _round_up(n, 256 if n >= 256 else 128)


def _mlp_kernel(x_ref, w1_ref, b1_ref, w2_ref, b2_ref, w3_ref, b3_ref, o_ref):
    """Fused 3-layer MLP: (matmul + bias + ReLU) x2 + output matmul + bias."""
    cdt = w1_ref.dtype  # MXU compute dtype (bf16); x is pre-cast in the wrapper.

    # Layer 1: Linear(d_in -> Hp) + ReLU.  f32 accumulation, f32 elementwise
    # (keep elementwise in f32: correct/fast path on v5e which has no bf16 VPU).
    h = jnp.dot(x_ref[...], w1_ref[...],
                preferred_element_type=jnp.float32) + b1_ref[...]
    h = jnp.maximum(h, 0.0)

    # Layer 2: Linear(Hp -> Hp) + ReLU  (hidden_layers=2 -> one extra hidden block).
    h = jnp.dot(h.astype(cdt), w2_ref[...],
                preferred_element_type=jnp.float32) + b2_ref[...]
    h = jnp.maximum(h, 0.0)

    # Output layer: Linear(Hp -> Np), no activation.  Dropout p=0.0 == identity.
    out = jnp.dot(h.astype(cdt), w3_ref[...],
                  preferred_element_type=jnp.float32) + b3_ref[...]
    o_ref[...] = out.astype(o_ref.dtype)


def _physical_vmem_bytes():
    try:
        return int(pltpu.get_tpu_info().vmem_capacity_bytes)
    except Exception:
        return 64 << 20  # v7x per-TC VMEM: the smallest across v5e/v6e/v7x.


def _vmem_budget_bytes(tb, d_in, hp, np_, w_bytes, x_bytes, out_bytes):
    # Double-buffered streamed tiles (x read, out writeback) ...
    xb = 2 * tb * d_in * x_bytes
    ob = 2 * tb * np_ * out_bytes
    # ... plus SINGLE-buffered resident weights & biases (constant index_maps,
    # pipeline_mode=pl.Buffered(1) -> one VMEM copy only).
    wb = (d_in * hp + hp * hp + hp * np_) * w_bytes + (2 * hp + np_) * 4
    need = xb + ob + wb
    cap = _physical_vmem_bytes()
    # Headroom for compiler scratch, clamped just below physical VMEM per core.
    return int(min(max(2 * need + (8 << 20), 16 << 20), int(cap * 0.9)))


def mlp_forward(x, params, num_outputs, *, block_b=512, out_dtype=jnp.float32):
    """x: (B, seq_len, num_inputs) float32. Returns (B, num_outputs) out_dtype.

    `params` must come from `prepare_params` (lane-padded feature dims, bf16
    weights, f32 biases).  For large-B memory-bound runs, out_dtype=jnp.bfloat16
    halves the dominant output-writeback HBM stream.
    """
    w1, b1, w2, b2, w3, b3 = params
    B = x.shape[0]
    # Glue: x.view(x.size(0), -1); cast once to bf16 so the streamed activation
    # DMA moves half the bytes (numerics unchanged: the MXU operand is bf16).
    x_flat = x.reshape(B, -1).astype(w1.dtype)
    d_in = x_flat.shape[1]
    Hp = w1.shape[1]           # hidden size, lane-padded
    Np = w3.shape[1]           # output size, lane-padded

    # Batch tile: multiple of 8, large by default (512) so per-grid-step
    # overhead is amortized and the streamed DMAs approach the HBM roofline.
    TB = min(block_b, _round_up(B, 8))
    Bp = _round_up(B, TB)
    if Bp != B:
        x_flat = jnp.pad(x_flat, ((0, Bp - B), (0, 0)))

    grid = (Bp // TB,)
    w_bytes = jnp.dtype(w1.dtype).itemsize
    x_bytes = jnp.dtype(x_flat.dtype).itemsize
    out_bytes = jnp.dtype(out_dtype).itemsize

    resident = pl.Buffered(1)  # constant index_map -> one VMEM copy is enough

    flops = 2 * Bp * (d_in * Hp + Hp * Hp + Hp * Np)
    bytes_accessed = (Bp * d_in * x_bytes + Bp * Np * out_bytes
                      + (d_in * Hp + Hp * Hp + Hp * Np) * w_bytes
                      + (2 * Hp + Np) * 4)

    out = pl.pallas_call(
        _mlp_kernel,
        out_shape=jax.ShapeDtypeStruct((Bp, Np), out_dtype),
        grid=grid,
        in_specs=[
            # Activations: streamed / double-buffered across the batch grid.
            pl.BlockSpec((TB, d_in), lambda i: (i, 0)),
            # Weights & biases: constant index_map + single buffer -> resident
            # in VMEM across all grid steps at half the default footprint.
            pl.BlockSpec((d_in, Hp), lambda i: (0, 0), pipeline_mode=resident),
            pl.BlockSpec((1, Hp), lambda i: (0, 0), pipeline_mode=resident),
            pl.BlockSpec((Hp, Hp), lambda i: (0, 0), pipeline_mode=resident),
            pl.BlockSpec((1, Hp), lambda i: (0, 0), pipeline_mode=resident),
            pl.BlockSpec((Hp, Np), lambda i: (0, 0), pipeline_mode=resident),
            pl.BlockSpec((1, Np), lambda i: (0, 0), pipeline_mode=resident),
        ],
        out_specs=pl.BlockSpec((TB, Np), lambda i: (i, 0)),
        compiler_params=pltpu.CompilerParams(
            dimension_semantics=("parallel",),
            vmem_limit_bytes=_vmem_budget_bytes(
                TB, d_in, Hp, Np, w_bytes, x_bytes, out_bytes),
        ),
        cost_estimate=pl.CostEstimate(
            flops=flops, transcendentals=0, bytes_accessed=bytes_accessed),
    )(x_flat, w1, b1, w2, b2, w3, b3)

    # Slice away batch padding and lane padding of the output features.
    return out[:B, :num_outputs]


def init_params(key, num_inputs, sequence_length, hidden_size, num_outputs):
    """Deterministic init matching the nn.Linear shapes (stored as (in, out))."""
    d_in = num_inputs * sequence_length
    keys = jax.random.split(key, 6)

    def linear(kw, kb, fan_in, fan_out):
        # PyTorch default: U(-1/sqrt(fan_in), 1/sqrt(fan_in)) for W and b.
        bound = 1.0 / jnp.sqrt(fan_in)
        w = jax.random.uniform(kw, (fan_in, fan_out), jnp.float32, -bound, bound)
        b = jax.random.uniform(kb, (1, fan_out), jnp.float32, -bound, bound)
        return w, b

    w1, b1 = linear(keys[0], keys[1], d_in, hidden_size)
    w2, b2 = linear(keys[2], keys[3], hidden_size, hidden_size)
    w3, b3 = linear(keys[4], keys[5], hidden_size, num_outputs)
    return (w1, b1, w2, b2, w3, b3)


def prepare_params(raw_params, compute_dtype=jnp.bfloat16):
    """Pad hidden/output feature dims to lane-dense multiples (128, or 256 when
    the real dim is >=256, to fill the v6e/v7x MXUs) and cast weights to the
    MXU compute dtype.  Zero padding is mathematically exact.

    Note: for the tiny H=32 example the 32->128 hidden padding is pure
    launch/DMA-latency noise; only the HBM-facing output lane dim strictly
    needs 128 for an unmasked store.
    """
    w1, b1, w2, b2, w3, b3 = raw_params
    H = w1.shape[1]
    d_out = w3.shape[1]
    Hp = _pad_to_lanes(H)
    Np = _pad_to_lanes(d_out)

    w1p = jnp.pad(w1, ((0, 0), (0, Hp - H))).astype(compute_dtype)
    b1p = jnp.pad(b1, ((0, 0), (0, Hp - H)))                       # f32 bias
    w2p = jnp.pad(w2, ((0, Hp - H), (0, Hp - H))).astype(compute_dtype)
    b2p = jnp.pad(b2, ((0, 0), (0, Hp - H)))
    w3p = jnp.pad(w3, ((0, Hp - H), (0, Np - d_out))).astype(compute_dtype)
    b3p = jnp.pad(b3, ((0, 0), (0, Np - d_out)))
    return (w1p, b1p, w2p, b2p, w3p, b3p)


def ref_forward(x, raw_params, compute_dtype=jnp.bfloat16):
    """Plain-JAX reference with the same numerics (bf16 dots, f32 accumulation)."""
    w1, b1, w2, b2, w3, b3 = raw_params
    xf = x.reshape(x.shape[0], -1)

    def dot(a, w):
        return jnp.dot(a.astype(compute_dtype), w.astype(compute_dtype),
                       preferred_element_type=jnp.float32)

    h = jnp.maximum(dot(xf, w1) + b1, 0.0)
    h = jnp.maximum(dot(h, w2) + b2, 0.0)
    return dot(h, w3) + b3


if __name__ == "__main__":
    # Config: num_inputs=4, sequence_length=8, hidden_layers=2, hidden_size=32,
    #         num_outputs=3, activation='relu', dropout=0.0, bias=True
    num_inputs, seq_len, hidden_size, num_outputs = 4, 8, 32, 3
    batch = 8

    key = jax.random.PRNGKey(0)
    k_x, k_p = jax.random.split(key)
    x = jax.random.normal(k_x, (batch, seq_len, num_inputs), jnp.float32)
    raw_params = init_params(k_p, num_inputs, seq_len, hidden_size, num_outputs)
    params = prepare_params(raw_params)  # lane-padded, bf16 weights

    fwd = jax.jit(functools.partial(mlp_forward, num_outputs=num_outputs))
    out = fwd(x, params)
    out = jax.block_until_ready(out)

    # Reference check (same bf16-dot / f32-accumulate numerics in plain JAX).
    ref = ref_forward(x, raw_params)
    assert out.shape == (batch, num_outputs)
    assert jnp.allclose(out, ref, atol=1e-2, rtol=1e-2), (
        f"max abs err {jnp.max(jnp.abs(out - ref))}")

    print("KERNEL_OK")
</pallas_src>

<mosaic_0001>
module attributes {stable_mosaic.version = 11 : i64} {
  func.func @_mlp_kernel(%arg0: i32, %arg1: memref<8x32xbf16, #tpu.memory_space<vmem>>, %arg2: memref<32x128xbf16, #tpu.memory_space<vmem>>, %arg3: memref<1x128xf32, #tpu.memory_space<vmem>>, %arg4: memref<128x128xbf16, #tpu.memory_space<vmem>>, %arg5: memref<1x128xf32, #tpu.memory_space<vmem>>, %arg6: memref<128x128xbf16, #tpu.memory_space<vmem>>, %arg7: memref<1x128xf32, #tpu.memory_space<vmem>>, %arg8: memref<8x128xf32, #tpu.memory_space<vmem>>) attributes {dimension_semantics = [#tpu.dimension_semantics<parallel>], iteration_bounds = array<i64: 1>, scalar_prefetch = 0 : i64, scratch_operands = 0 : i64, tpu.core_type = #tpu.core_type<tc>, window_params = [{transform_indices = @transform_0, window_bounds = array<i64: 8, 32>}, {pipeline_mode = #tpu.pipeline_mode<synchronous>, transform_indices = @transform_1, window_bounds = array<i64: 32, 128>}, {pipeline_mode = #tpu.pipeline_mode<synchronous>, transform_indices = @transform_2, window_bounds = array<i64: 1, 128>}, {pipeline_mode = #tpu.pipeline_mode<synchronous>, transform_indices = @transform_3, window_bounds = array<i64: 128, 128>}, {pipeline_mode = #tpu.pipeline_mode<synchronous>, transform_indices = @transform_4, window_bounds = array<i64: 1, 128>}, {pipeline_mode = #tpu.pipeline_mode<synchronous>, transform_indices = @transform_5, window_bounds = array<i64: 128, 128>}, {pipeline_mode = #tpu.pipeline_mode<synchronous>, transform_indices = @transform_6, window_bounds = array<i64: 1, 128>}, {transform_indices = @transform_7, window_bounds = array<i64: 8, 128>}]} {
    %c0 = arith.constant 0 : index
    %c0_0 = arith.constant 0 : index
    %0 = vector.load %arg1[%c0, %c0_0] : memref<8x32xbf16, #tpu.memory_space<vmem>>, vector<8x32xbf16>
    %c0_1 = arith.constant 0 : index
    %c0_2 = arith.constant 0 : index
    %1 = vector.load %arg2[%c0_1, %c0_2] : memref<32x128xbf16, #tpu.memory_space<vmem>>, vector<32x128xbf16>
    %cst = arith.constant dense<0.000000e+00> : vector<8x128xf32>
    %2 = tpu.matmul %0, %1, %cst {dimension_numbers = #tpu.dot_dimension_numbers<[1], [0], [0], [1], [0, 0, 1, 1], [], []>} : vector<8x32xbf16>, vector<32x128xbf16>, vector<8x128xf32> -> vector<8x128xf32>
    %c0_3 = arith.constant 0 : index
    %c0_4 = arith.constant 0 : index
    %3 = vector.load %arg3[%c0_3, %c0_4] : memref<1x128xf32, #tpu.memory_space<vmem>>, vector<1x128xf32>
    %4 = vector.broadcast %3 : vector<1x128xf32> to vector<8x128xf32>
    %5 = arith.addf %2, %4 : vector<8x128xf32>
    %cst_5 = arith.constant 0.000000e+00 : f32
    %6 = vector.broadcast %cst_5 : f32 to vector<8x128xf32>
    %7 = arith.maximumf %5, %6 : vector<8x128xf32>
    %8 = arith.truncf %7 : vector<8x128xf32> to vector<8x128xbf16>
    %c0_6 = arith.constant 0 : index
    %c0_7 = arith.constant 0 : index
    %9 = vector.load %arg4[%c0_6, %c0_7] : memref<128x128xbf16, #tpu.memory_space<vmem>>, vector<128x128xbf16>
    %cst_8 = arith.constant dense<0.000000e+00> : vector<8x128xf32>
    %10 = tpu.matmul %8, %9, %cst_8 {dimension_numbers = #tpu.dot_dimension_numbers<[1], [0], [0], [1], [0, 0, 1, 1], [], []>} : vector<8x128xbf16>, vector<128x128xbf16>, vector<8x128xf32> -> vector<8x128xf32>
    %c0_9 = arith.constant 0 : index
    %c0_10 = arith.constant 0 : index
    %11 = vector.load %arg5[%c0_9, %c0_10] : memref<1x128xf32, #tpu.memory_space<vmem>>, vector<1x128xf32>
    %12 = vector.broadcast %11 : vector<1x128xf32> to vector<8x128xf32>
    %13 = arith.addf %10, %12 : vector<8x128xf32>
    %cst_11 = arith.constant 0.000000e+00 : f32
    %14 = vector.broadcast %cst_11 : f32 to vector<8x128xf32>
    %15 = arith.maximumf %13, %14 : vector<8x128xf32>
    %16 = arith.truncf %15 : vector<8x128xf32> to vector<8x128xbf16>
    %c0_12 = arith.constant 0 : index
    %c0_13 = arith.constant 0 : index
    %17 = vector.load %arg6[%c0_12, %c0_13] : memref<128x128xbf16, #tpu.memory_space<vmem>>, vector<128x128xbf16>
    %cst_14 = arith.constant dense<0.000000e+00> : vector<8x128xf32>
    %18 = tpu.matmul %16, %17, %cst_14 {dimension_numbers = #tpu.dot_dimension_numbers<[1], [0], [0], [1], [0, 0, 1, 1], [], []>} : vector<8x128xbf16>, vector<128x128xbf16>, vector<8x128xf32> -> vector<8x128xf32>
    %c0_15 = arith.constant 0 : index
    %c0_16 = arith.constant 0 : index
    %19 = vector.load %arg7[%c0_15, %c0_16] : memref<1x128xf32, #tpu.memory_space<vmem>>, vector<1x128xf32>
    %20 = vector.broadcast %19 : vector<1x128xf32> to vector<8x128xf32>
    %21 = arith.addf %18, %20 : vector<8x128xf32>
    %c0_17 = arith.constant 0 : index
    %c0_18 = arith.constant 0 : index
    %22 = vector.load %arg8[%c0_17, %c0_18] : memref<8x128xf32, #tpu.memory_space<vmem>>, vector<8x128xf32>
    tpu.vector_store %arg8[%c0_17, %c0_18], %21 {strides = array<i32>} : memref<8x128xf32, #tpu.memory_space<vmem>>, vector<8x128xf32>,
    return
  }
  func.func @transform_0(%arg0: i32) -> (i32, i32) {
    %c0_i32 = arith.constant 0 : i32
    %c0_i32_0 = arith.constant 0 : i32
    return %arg0, %c0_i32 : i32, i32
  }
  func.func @transform_1(%arg0: i32) -> (i32, i32) {
    %c0_i32 = arith.constant 0 : i32
    %c0_i32_0 = arith.constant 0 : i32
    %c0_i32_1 = arith.constant 0 : i32
    return %c0_i32, %c0_i32_0 : i32, i32
  }
  func.func @transform_2(%arg0: i32) -> (i32, i32) {
    %c0_i32 = arith.constant 0 : i32
    %c0_i32_0 = arith.constant 0 : i32
    %c0_i32_1 = arith.constant 0 : i32
    return %c0_i32, %c0_i32_0 : i32, i32
  }
  func.func @transform_3(%arg0: i32) -> (i32, i32) {
    %c0_i32 = arith.constant 0 : i32
    %c0_i32_0 = arith.constant 0 : i32
    %c0_i32_1 = arith.constant 0 : i32
    return %c0_i32, %c0_i32_0 : i32, i32
  }
  func.func @transform_4(%arg0: i32) -> (i32, i32) {
    %c0_i32 = arith.constant 0 : i32
    %c0_i32_0 = arith.constant 0 : i32
    %c0_i32_1 = arith.constant 0 : i32
    return %c0_i32, %c0_i32_0 : i32, i32
  }
  func.func @transform_5(%arg0: i32) -> (i32, i32) {
    %c0_i32 = arith.constant 0 : i32
    %c0_i32_0 = arith.constant 0 : i32
    %c0_i32_1 = arith.constant 0 : i32
    return %c0_i32, %c0_i32_0 : i32, i32
  }
  func.func @transform_6(%arg0: i32) -> (i32, i32) {
    %c0_i32 = arith.constant 0 : i32
    %c0_i32_0 = arith.constant 0 : i32
    %c0_i32_1 = arith.constant 0 : i32
    return %c0_i32, %c0_i32_0 : i32, i32
  }
  func.func @transform_7(%arg0: i32) -> (i32, i32) {
    %c0_i32 = arith.constant 0 : i32
    %c0_i32_0 = arith.constant 0 : i32
    return %arg0, %c0_i32 : i32, i32
  }
}

</mosaic_0001>

<bundles_post_ra>
// kernel: mlp_forward.1
= control target key start
LH: loop header
LB: loop body
LE: loop exit
PB: predicated region body
PF: predicated region fallthrough
CT: control target
= control target key end

     0   :  { %12 = vsyncpa [#allocation3], 0  ;;  %s477_s24 = smov [#allocation2]   ;;  %s594_s0 = inlined_call_operand.vmem [shape: bf16[8,32], index: 0, kind: input, shape index: {}]   ;;  %s595_s1 = inlined_call_operand.vmem [shape: bf16[32,128], index: 1, kind: input, shape index: {}]   ;;  %s596_s2 = inlined_call_operand.vmem [shape: f32[1,128], index: 2, kind: input, shape index: {}]   ;;  %s597_s3 = inlined_call_operand.vmem [shape: bf16[128,128], index: 3, kind: input, shape index: {}]   ;;  %s598_s4 = inlined_call_operand.vmem [shape: f32[1,128], index: 4, kind: input, shape index: {}]   ;;  %s599_s5 = inlined_call_operand.hbm [shape: bf16[128,128], index: 5, kind: input, shape index: {}]   ;;  %s600_s6 = inlined_call_operand.vmem [shape: f32[1,128], index: 6, kind: input, shape index: {}]   ;;  %s601_s7 = inlined_call_operand.vmem [shape: f32[8,128], index: 7, kind: output, shape index: {}]  }
   0x1   :  { %s28_s25 = sshll.u32 %s477_s24, 4  ;;  %s29_s25 = int_to_ptr.vmem [resolvable:$true] %s28_s25 }
   0x2   :  { %s463_s26 = scalar_lea.vmem %s29_s25, 1024  ;;  %p468_p1 = scmp.lt.s32.totalorder %s29_s25, %s29_s25 }
   0x3   :  { %p464_p0 = scmp.ne.s32.totalorder %s29_s25, %s463_s26  ;;  %p469_p2 = scmp.lt.s32.totalorder %s463_s26, %s463_s26 }
   0x5   :  { %p470_p3 = por %p469_p2, %p468_p1 }
   0x7   :  { %p471_p4 = pnand %p470_p3, %p464_p0 }
   0x9   :  { %474 = shalt.err (!%p471_p4)
}
   0xa   :  { %s478_s27 = smov 64   ;;  %s479_s28 = smov 4  }
   0xb   :  { %34 = dma.hbm_to_vmem [thread:$0]  %s599_s5, 1024, %s29_s25, [#allocation3], %s478_s27, %s478_s27, %s479_s28  }
   0xc   :  { %475 = dma.done.wait [#allocation3], 1024  }
   0xd   :  { %476 = vsyncadd [#allocation3], 4294966272  ;;  %v480_v0 = vmov 0.0   ;;  %vm481_vm0 = vmmov 0   ;;  %v437_v1 = vld [vmem:[%s595_s1 + $0x8] sm:$0xff]   ;;  %v438_v2 = vld [vmem:[%s595_s1] sm:$0xff]  }
   0xe   :  { %384 = vmatprep.subr.bf16.mxu0 %v480_v0  ;;  %388 = vmatprep.mubr.msk.bf16.mxu0 %vm481_vm0, %v480_v0  ;;  %v439_v3 = vld [vmem:[%s597_s3 + $0x38] sm:$0xff]   ;;  %vm65_vm1 = vcmask 261120   ;;  %v440_v4 = vld [vmem:[%s597_s3 + $0x30] sm:$0xff]   ;;  %v41_v5 = vld [vmem:[%s594_s0] sm:$0xf] }
   0xf   :  { %392 = vmatprep.subr.bf16.mxu1 %v480_v0  ;;  %408 = vmatprep.mubr.msk.bf16.mxu1 %vm481_vm0, %v480_v0  ;;  %v441_v6 = vld [vmem:[%s597_s3 + $0x28] sm:$0xff]   ;;  %v442_v7 = vld [vmem:[%s597_s3 + $0x20] sm:$0xff]   ;;  %v443_v8 = vld [vmem:[%s597_s3 + $0x18] sm:$0xff]  }
  0x10   :  { %385 = vmatpush3.bf16.msra.mxu0 %v437_v1  ;;  %393 = vmatpush3.bf16.msra.mxu1 %v439_v3  ;;  %v444_v9 = vld [vmem:[%s597_s3 + $0x10] sm:$0xff]   ;;  %v445_v10 = vld [vmem:[%s597_s3 + $0x8] sm:$0xff]   ;;  %v446_v11 = vld [vmem:[%s597_s3] sm:$0xff]  }
  0x11   :  { %386 = vmatprep.subr.bf16.mxu0 %v480_v0  ;;  %394 = vmatprep.subr.bf16.mxu1 %v480_v0  ;;  %v447_v12 = vld [vmem:[#allocation2 + $0x38] sm:$0xff]   ;;  %v448_v13 = vld [vmem:[#allocation2 + $0x30] sm:$0xff]   ;;  %v449_v14 = vld [vmem:[#allocation2 + $0x28] sm:$0xff]  }
  0x12   :  { %v450_v15 = vld [vmem:[#allocation2 + $0x20] sm:$0xff]   ;;  %v451_v16 = vld [vmem:[#allocation2 + $0x18] sm:$0xff]   ;;  %v452_v17 = vld [vmem:[#allocation2 + $0x10] sm:$0xff]  }
  0x13   :  { %v341_v18 = vld [vmem:[%s596_s2] ss:$0 sm:$0xff]  ;;  %v453_v26 = vld [vmem:[#allocation2 + $0x8] sm:$0xff]  }
  0x14   :  { %387 = vmatpush3.bf16.msra.mxu0 %v438_v2  ;;  %395 = vmatpush3.bf16.msra.mxu1 %v440_v4  ;;  %v454_v27 = vld [vmem:[#allocation2] sm:$0xff]  }
  0x15   :  { %412 = vmatprep.subr.bf16.mxu0 %v480_v0  ;;  %396 = vmatprep.subr.bf16.mxu1 %v480_v0  ;;  %v345_v28 = vld [vmem:[%s598_s4] ss:$0 sm:$0xff] }
  0x16   :  { %v354_v36 = vld [vmem:[%s600_s6] ss:$0 sm:$0xff] }
  0x17   :  { %389 = vmatmul.mubr.msk.bf16.vlgmr.msra.gmra.mxu0 %vm65_vm1, %v41_v5 }
  0x18   :  { %428 = vmatprep.mubr.msk.bf16.mxu0 %vm481_vm0, %v480_v0  ;;  %397 = vmatpush3.bf16.msra.mxu1 %v441_v6 }
  0x19   :  { %398 = vmatprep.subr.bf16.mxu1 %v480_v0  ;;  %413 = vmatpush3.bf16.msra.mxu0 %v447_v12 }
  0x1a   :  { %414 = vmatprep.subr.bf16.mxu0 %v480_v0 }
  0x1c   :  { %399 = vmatpush3.bf16.msra.mxu1 %v442_v7 }
  0x1d   :  { %400 = vmatprep.subr.bf16.mxu1 %v480_v0  ;;  %415 = vmatpush3.bf16.msra.mxu0 %v448_v13 }
  0x1e   :  { %416 = vmatprep.subr.bf16.mxu0 %v480_v0 }
  0x20   :  { %401 = vmatpush3.bf16.msra.mxu1 %v443_v8 }
  0x21   :  { %402 = vmatprep.subr.bf16.mxu1 %v480_v0  ;;  %417 = vmatpush3.bf16.msra.mxu0 %v449_v14 }
  0x22   :  { %418 = vmatprep.subr.bf16.mxu0 %v480_v0 }
  0x24   :  { %403 = vmatpush3.bf16.msra.mxu1 %v444_v9 }
  0x25   :  { %404 = vmatprep.subr.bf16.mxu1 %v480_v0  ;;  %419 = vmatpush3.bf16.msra.mxu0 %v450_v15 }
  0x26   :  { %420 = vmatprep.subr.bf16.mxu0 %v480_v0 }
  0x28   :  { %405 = vmatpush3.bf16.msra.mxu1 %v445_v10 }
  0x29   :  { %406 = vmatprep.subr.bf16.mxu1 %v480_v0  ;;  %421 = vmatpush3.bf16.msra.mxu0 %v451_v16 }
  0x2a   :  { %422 = vmatprep.subr.bf16.mxu0 %v480_v0 }
  0x2c   :  { %407 = vmatpush3.bf16.msra.mxu1 %v446_v11 }
  0x2d   :  { %423 = vmatpush3.bf16.msra.mxu0 %v452_v17 }
  0x2e   :  { %424 = vmatprep.subr.bf16.mxu0 %v480_v0 }
  0x31   :  { %425 = vmatpush3.bf16.msra.mxu0 %v453_v26 }
  0x32   :  { %426 = vmatprep.subr.bf16.mxu0 %v480_v0 }
  0x35   :  { %427 = vmatpush3.bf16.msra.mxu0 %v454_v27 }
  0xd7   :  { %v103_v19 = vpop.f32.mrf.mxu0 }
  0xd8   :  { %v104_v20 = vadd.f32 %v341_v18, %v103_v19 }
  0xd9   :  { %v390_v21 = vpop.f32.mrf.mxu0 }
  0xda   :  { %v109_v22 = vmax.f32 %v104_v20, 0.0 }
  0xdb   :  { %v106_v23 = vpop.f32.mrf.mxu0 }
  0xdc   :  { %v110_v24 = vpack.c.bf16 %v109_v22, %v109_v22 }
  0xdd   :  { %v391_v25 = vpop.f32.mrf.mxu0 }
  0xde   :  { %409 = vmatmul.mubr.bf16.vlgmr.msra.gmra.mxu1 %v110_v24 }
 0x19e   :  { %v216_v29 = vpop.f32.mrf.mxu1 }
 0x19f   :  { %v217_v30 = vadd.f32 %v345_v28, %v216_v29 }
 0x1a0   :  { %v410_v31 = vpop.f32.mrf.mxu1 }
 0x1a1   :  { %v222_v32 = vmax.f32 %v217_v30, 0.0 }
 0x1a2   :  { %v219_v33 = vpop.f32.mrf.mxu1 }
 0x1a3   :  { %v223_v34 = vpack.c.bf16 %v222_v32, %v222_v32 }
 0x1a4   :  { %v411_v35 = vpop.f32.mrf.mxu1 }
 0x1a5   :  { %429 = vmatmul.mubr.bf16.vlgmr.msra.gmra.mxu0 %v223_v34 }
 0x265   :  { %v329_v37 = vpop.f32.mrf.mxu0 }
 0x266   :  { %v330_v38 = vadd.f32 %v354_v36, %v329_v37 }
 0x267   :  { %v430_v39 = vpop.f32.mrf.mxu0 }
 0x268   :  { %335 = vst [vmem:[%s601_s7] sm:$0xff] %v330_v38 }
 0x269   :  { %v332_v40 = vpop.f32.mrf.mxu0 }
 0x26b   :  { %v431_v41 = vpop.f32.mrf.mxu0 }
 0x26c   :  { %340 = vsyncpa [#allocation3], 1 }

</bundles_post_ra>
